<compile_context>
chip_gen: v5e
topology: v5e:2x2
jax: 0.10.0
libtpu: 0.0.40
codegen_flags: <defaults>
</compile_context>

<pallas_src>
import functools

import jax
import jax.numpy as jnp
from jax.experimental import pallas as pl
from jax.experimental.pallas import tpu as pltpu


def _mlp_kernel(x_ref, w1_ref, b1_ref, w2_ref, b2_ref, o_ref):
    # First matmul + bias + ReLU (MXU matmul, VPU elementwise), f32 accumulation.
    h = jnp.dot(x_ref[...], w1_ref[...], preferred_element_type=jnp.float32)
    h = h + b1_ref[...]                      # b1 is (1, H), broadcasts over batch tile
    h = jnp.maximum(h, 0.0)                  # ReLU
    # TODO(synk): training-mode Dropout (random mask + 1/(1-p) scale) not applied; eval identity.
    # Second matmul against the lane-dense (H, c_pad) padded weight tile.
    out = jnp.dot(h, w2_ref[...], preferred_element_type=jnp.float32)
    out = out + b2_ref[...]                  # b2 is (1, c_pad)
    # Store only the real C class columns (narrow, lane-masked vst); padded
    # columns never reach HBM.
    c = o_ref.shape[1]
    o_ref[...] = out[:, :c].astype(o_ref.dtype)


def _round_up(v, m):
    return ((v + m - 1) // m) * m


@functools.partial(jax.jit, static_argnames=("block_b",))
def feature_classifier(x, w1, b1, w2, b2, *, block_b=1024):
    """x: [B, D] f32; w1: [D, H]; b1: [H] or [1, H]; w2: [H, C]; b2: [C] or [1, C] -> [B, C]."""
    B, D = x.shape
    H = w1.shape[1]
    C = w2.shape[1]
    b1 = b1.reshape(1, H)
    b2 = b2.reshape(1, C)

    # --- lane-dense class dim for the MXU: pad w2/b2 (not the output) to 128 ---
    LANE = 128
    c_pad = max(LANE, _round_up(C, LANE))
    if c_pad != C:
        w2p = jnp.zeros((H, c_pad), w2.dtype).at[:, :C].set(w2)
        b2p = jnp.zeros((1, c_pad), b2.dtype).at[:, :C].set(b2)
    else:
        w2p, b2p = w2, b2

    # --- batch tiling: sublane-aligned tile; ensure >= 2 grid steps for v7x ----
    tb = min(block_b, max(8, _round_up(pl.cdiv(B, 2), 8)))
    tb = max(tb, 8)
    grid = (pl.cdiv(B, tb),)                 # no batch padding; boundary block is masked

    # VMEM estimate: double-buffered x/out tiles + intermediates + resident weights.
    io_bytes = 2 * (tb * D + tb * C) * 4
    inter_bytes = (tb * H + tb * c_pad) * 4
    w_bytes = (D * H + H + H * c_pad + c_pad) * 4
    vmem_limit = int(min(max(2 * (io_bytes + inter_bytes + w_bytes), 4 << 20), 48 << 20))

    cost = pl.CostEstimate(
        flops=int(2 * B * (D * H + H * c_pad)),
        transcendentals=0,
        bytes_accessed=int(B * (D + C) * 4 + w_bytes),
    )

    out = pl.pallas_call(
        _mlp_kernel,
        out_shape=jax.ShapeDtypeStruct((B, C), x.dtype),
        grid_spec=pl.GridSpec(
            grid=grid,
            in_specs=[
                pl.BlockSpec((tb, D), lambda i: (i, 0)),      # x tile marches over batch
                pl.BlockSpec((D, H), lambda i: (0, 0)),       # weights: constant index_map,
                pl.BlockSpec((1, H), lambda i: (0, 0)),       # stay resident across grid steps
                pl.BlockSpec((H, c_pad), lambda i: (0, 0)),
                pl.BlockSpec((1, c_pad), lambda i: (0, 0)),
            ],
            out_specs=pl.BlockSpec((tb, C), lambda i: (i, 0)),  # narrow output: only C cols to HBM
        ),
        compiler_params=pltpu.CompilerParams(
            dimension_semantics=("parallel",),                # batch axis -> both TCs on v7x
            vmem_limit_bytes=vmem_limit,
        ),
        cost_estimate=cost,
    )(x, w1, b1, w2p, b2p)

    return out


def _reference(x, w1, b1, w2, b2):
    return jnp.maximum(x @ w1 + b1.reshape(1, -1), 0.0) @ w2 + b2.reshape(1, -1)


if __name__ == "__main__":
    # Shapes consistent with the module: input_dim=32, hidden_dim=256, num_classes=2.
    D, H, C = 32, 256, 2
    key = jax.random.PRNGKey(0)
    kx, k1, k2, k3, k4, kx2 = jax.random.split(key, 6)

    # PyTorch stores Linear weight as [out, in]; the kernel uses the
    # transposed [in, out] layout so it can do x @ W directly.
    w1 = jax.random.normal(k1, (D, H), dtype=jnp.float32) * (1.0 / jnp.sqrt(D))
    b1 = jax.random.normal(k2, (1, H), dtype=jnp.float32) * 0.01
    w2 = jax.random.normal(k3, (H, C), dtype=jnp.float32) * (1.0 / jnp.sqrt(H))
    b2 = jax.random.normal(k4, (1, C), dtype=jnp.float32) * 0.01

    # Check 1: tiny batch (single grid step, narrow masked output store).
    B = 8
    x = jax.random.normal(kx, (B, D), dtype=jnp.float32)
    out = jax.block_until_ready(feature_classifier(x, w1, b1, w2, b2))
    ref = _reference(x, w1, b1, w2, b2)
    assert out.shape == (B, C)
    assert jnp.allclose(out, ref, atol=1e-5, rtol=1e-5)

    # Check 2: non-multiple batch with a multi-step grid (exercises boundary
    # masking on the ragged last block and the parallel batch axis).
    B2 = 300
    x2 = jax.random.normal(kx2, (B2, D), dtype=jnp.float32)
    out2 = jax.block_until_ready(
        feature_classifier(x2, w1, b1, w2, b2, block_b=128))
    ref2 = _reference(x2, w1, b1, w2, b2)
    assert out2.shape == (B2, C)
    assert jnp.allclose(out2, ref2, atol=1e-4, rtol=1e-4)

    print("KERNEL_OK")
</pallas_src>

<mosaic_0001>
module attributes {stable_mosaic.version = 11 : i64} {
  func.func @_mlp_kernel(%arg0: i32, %arg1: memref<8x32xf32, #tpu.memory_space<vmem>>, %arg2: memref<32x256xf32, #tpu.memory_space<vmem>>, %arg3: memref<1x256xf32, #tpu.memory_space<vmem>>, %arg4: memref<256x128xf32, #tpu.memory_space<vmem>>, %arg5: memref<1x128xf32, #tpu.memory_space<vmem>>, %arg6: memref<8x2xf32, #tpu.memory_space<vmem>>) attributes {dimension_semantics = [#tpu.dimension_semantics<parallel>], iteration_bounds = array<i64: 1>, scalar_prefetch = 0 : i64, scratch_operands = 0 : i64, tpu.core_type = #tpu.core_type<tc>, window_params = [{transform_indices = @transform_0, window_bounds = array<i64: 8, 32>}, {pipeline_mode = #tpu.pipeline_mode<synchronous>, transform_indices = @transform_1, window_bounds = array<i64: 32, 256>}, {pipeline_mode = #tpu.pipeline_mode<synchronous>, transform_indices = @transform_2, window_bounds = array<i64: 1, 256>}, {pipeline_mode = #tpu.pipeline_mode<synchronous>, transform_indices = @transform_3, window_bounds = array<i64: 256, 128>}, {pipeline_mode = #tpu.pipeline_mode<synchronous>, transform_indices = @transform_4, window_bounds = array<i64: 1, 128>}, {transform_indices = @transform_5, window_bounds = array<i64: 8, 2>}]} {
    %c0 = arith.constant 0 : index
    %c0_0 = arith.constant 0 : index
    %0 = vector.load %arg1[%c0, %c0_0] : memref<8x32xf32, #tpu.memory_space<vmem>>, vector<8x32xf32>
    %c0_1 = arith.constant 0 : index
    %c0_2 = arith.constant 0 : index
    %1 = vector.load %arg2[%c0_1, %c0_2] : memref<32x256xf32, #tpu.memory_space<vmem>>, vector<32x256xf32>
    %cst = arith.constant dense<0.000000e+00> : vector<8x256xf32>
    %2 = tpu.matmul %0, %1, %cst {dimension_numbers = #tpu.dot_dimension_numbers<[1], [0], [0], [1], [0, 0, 1, 1], [], []>} : vector<8x32xf32>, vector<32x256xf32>, vector<8x256xf32> -> vector<8x256xf32>
    %c0_3 = arith.constant 0 : index
    %c0_4 = arith.constant 0 : index
    %3 = vector.load %arg3[%c0_3, %c0_4] : memref<1x256xf32, #tpu.memory_space<vmem>>, vector<1x256xf32>
    %4 = vector.broadcast %3 : vector<1x256xf32> to vector<8x256xf32>
    %5 = arith.addf %2, %4 : vector<8x256xf32>
    %cst_5 = arith.constant 0.000000e+00 : f32
    %6 = vector.broadcast %cst_5 : f32 to vector<8x256xf32>
    %7 = arith.maximumf %5, %6 : vector<8x256xf32>
    %c0_6 = arith.constant 0 : index
    %c0_7 = arith.constant 0 : index
    %8 = vector.load %arg4[%c0_6, %c0_7] : memref<256x128xf32, #tpu.memory_space<vmem>>, vector<256x128xf32>
    %cst_8 = arith.constant dense<0.000000e+00> : vector<8x128xf32>
    %9 = tpu.matmul %7, %8, %cst_8 {dimension_numbers = #tpu.dot_dimension_numbers<[1], [0], [0], [1], [0, 0, 1, 1], [], []>} : vector<8x256xf32>, vector<256x128xf32>, vector<8x128xf32> -> vector<8x128xf32>
    %c0_9 = arith.constant 0 : index
    %c0_10 = arith.constant 0 : index
    %10 = vector.load %arg5[%c0_9, %c0_10] : memref<1x128xf32, #tpu.memory_space<vmem>>, vector<1x128xf32>
    %11 = vector.broadcast %10 : vector<1x128xf32> to vector<8x128xf32>
    %12 = arith.addf %9, %11 : vector<8x128xf32>
    %13 = vector.extract_strided_slice %12 {offsets = [0, 0], sizes = [8, 2], strides = [1, 1]} : vector<8x128xf32> to vector<8x2xf32>
    %c0_11 = arith.constant 0 : index
    %c0_12 = arith.constant 0 : index
    %14 = vector.load %arg6[%c0_11, %c0_12] : memref<8x2xf32, #tpu.memory_space<vmem>>, vector<8x2xf32>
    tpu.vector_store %arg6[%c0_11, %c0_12], %13 {strides = array<i32>} : memref<8x2xf32, #tpu.memory_space<vmem>>, vector<8x2xf32>,
    return
  }
  func.func @transform_0(%arg0: i32) -> (i32, i32) {
    %c0_i32 = arith.constant 0 : i32
    %c0_i32_0 = arith.constant 0 : i32
    return %arg0, %c0_i32 : i32, i32
  }
  func.func @transform_1(%arg0: i32) -> (i32, i32) {
    %c0_i32 = arith.constant 0 : i32
    %c0_i32_0 = arith.constant 0 : i32
    %c0_i32_1 = arith.constant 0 : i32
    return %c0_i32, %c0_i32_0 : i32, i32
  }
  func.func @transform_2(%arg0: i32) -> (i32, i32) {
    %c0_i32 = arith.constant 0 : i32
    %c0_i32_0 = arith.constant 0 : i32
    %c0_i32_1 = arith.constant 0 : i32
    return %c0_i32, %c0_i32_0 : i32, i32
  }
  func.func @transform_3(%arg0: i32) -> (i32, i32) {
    %c0_i32 = arith.constant 0 : i32
    %c0_i32_0 = arith.constant 0 : i32
    %c0_i32_1 = arith.constant 0 : i32
    return %c0_i32, %c0_i32_0 : i32, i32
  }
  func.func @transform_4(%arg0: i32) -> (i32, i32) {
    %c0_i32 = arith.constant 0 : i32
    %c0_i32_0 = arith.constant 0 : i32
    %c0_i32_1 = arith.constant 0 : i32
    return %c0_i32, %c0_i32_0 : i32, i32
  }
  func.func @transform_5(%arg0: i32) -> (i32, i32) {
    %c0_i32 = arith.constant 0 : i32
    %c0_i32_0 = arith.constant 0 : i32
    return %arg0, %c0_i32 : i32, i32
  }
}

</mosaic_0001>

<bundles_post_ra>
// kernel: feature_classifier.1
= control target key start
LH: loop header
LB: loop body
LE: loop exit
PB: predicated region body
PF: predicated region fallthrough
CT: control target
= control target key end

     0   :  { %vm35_vm0 = vcmask 261120   ;;  %vm157_vm1 = vcmask 15360   ;;  %s328_s1 = inlined_call_operand.vmem [shape: f32[32,256], index: 1, kind: input, shape index: {}]   ;;  %s329_s3 = inlined_call_operand.vmem [shape: f32[256,128], index: 3, kind: input, shape index: {}]   ;;  %s330_s0 = inlined_call_operand.vmem [shape: f32[8,32], index: 0, kind: input, shape index: {}]   ;;  %s331_s4 = inlined_call_operand.vmem [shape: f32[1,128], index: 4, kind: input, shape index: {}]   ;;  %s332_s2 = inlined_call_operand.vmem [shape: f32[1,256], index: 2, kind: input, shape index: {}]   ;;  %s333_s5 = inlined_call_operand.vmem [shape: f32[8,2], index: 5, kind: output, shape index: {}]  }
   0x1   :  { %v27_v0 = vld [vmem:[%s328_s1 + $0x30] sm:$0xff]  ;;  %v25_v1 = vld [vmem:[%s328_s1 + $0x20] sm:$0xff]  ;;  %v28_v2 = vld [vmem:[%s328_s1 + $0x38] sm:$0xff] }
   0x2   :  { %51 = vmatpush.msra.mxu0 %v27_v0  ;;  %71 = vmatpush.msra.mxu1 %v28_v2  ;;  %v26_v3 = vld [vmem:[%s328_s1 + $0x28] sm:$0xff]  ;;  %v23_v4 = vld [vmem:[%s328_s1 + $0x10] sm:$0xff]  ;;  %v24_v5 = vld [vmem:[%s328_s1 + $0x18] sm:$0xff] }
   0x3   :  { %v96_v6 = vld [vmem:[%s329_s3 + $0x78] sm:$0xff]  ;;  %v95_v7 = vld [vmem:[%s329_s3 + $0x70] sm:$0xff]  ;;  %v21_v9 = vld [vmem:[%s328_s1] sm:$0xff] }
   0x4   :  { %52 = vmatpush.msra.mxu0 %v25_v1  ;;  %72 = vmatpush.msra.mxu1 %v26_v3  ;;  %v112_v8 = vld [vmem:[%s329_s3 + $0xf8] sm:$0xff]  ;;  %v22_v10 = vld [vmem:[%s328_s1 + $0x8] sm:$0xff]  ;;  %v111_v11 = vld [vmem:[%s329_s3 + $0xf0] sm:$0xff] }
   0x5   :  { %117 = vmatpush.msra.mxu2 %v96_v6  ;;  %137 = vmatpush.msra.mxu3 %v112_v8  ;;  %v20_v12 = vld [vmem:[%s330_s0] sm:$0xff]  ;;  %v94_v13 = vld [vmem:[%s329_s3 + $0x68] sm:$0xff]  ;;  %v92_v17 = vld [vmem:[%s329_s3 + $0x58] sm:$0xff] }
   0x6   :  { %53 = vmatpush.msra.mxu0 %v23_v4  ;;  %73 = vmatpush.msra.mxu1 %v24_v5  ;;  %v110_v14 = vld [vmem:[%s329_s3 + $0xe8] sm:$0xff]  ;;  %v93_v15 = vld [vmem:[%s329_s3 + $0x60] sm:$0xff]  ;;  %v108_v18 = vld [vmem:[%s329_s3 + $0xd8] sm:$0xff] }
   0x7   :  { %118 = vmatpush.msra.mxu2 %v95_v7  ;;  %138 = vmatpush.msra.mxu3 %v111_v11  ;;  %v109_v16 = vld [vmem:[%s329_s3 + $0xe0] sm:$0xff]  ;;  %v91_v19 = vld [vmem:[%s329_s3 + $0x50] sm:$0xff]  ;;  %v90_v21 = vld [vmem:[%s329_s3 + $0x48] sm:$0xff] }
   0x8   :  { %54 = vmatpush.msra.mxu0 %v21_v9  ;;  %74 = vmatpush.msra.mxu1 %v22_v10  ;;  %v107_v20 = vld [vmem:[%s329_s3 + $0xd0] sm:$0xff]  ;;  %v106_v22 = vld [vmem:[%s329_s3 + $0xc8] sm:$0xff]  ;;  %v89_v23 = vld [vmem:[%s329_s3 + $0x40] sm:$0xff] }
   0x9   :  { %163 = vmatmul.msk.f32.vlgmr.msra.gmra.mxu0 %vm35_vm0, %v20_v12  ;;  %164 = vmatmul.msk.f32.vlgmr.msra.gmra.mxu1 %vm35_vm0, %v20_v12  ;;  %v105_v24 = vld [vmem:[%s329_s3 + $0xc0] sm:$0xff]  ;;  %v88_v25 = vld [vmem:[%s329_s3 + $0x38] sm:$0xff]  ;;  %v87_v27 = vld [vmem:[%s329_s3 + $0x30] sm:$0xff] }
   0xa   :  { %119 = vmatpush.msra.mxu2 %v94_v13  ;;  %139 = vmatpush.msra.mxu3 %v110_v14  ;;  %v104_v26 = vld [vmem:[%s329_s3 + $0xb8] sm:$0xff]  ;;  %v103_v28 = vld [vmem:[%s329_s3 + $0xb0] sm:$0xff]  ;;  %v86_v29 = vld [vmem:[%s329_s3 + $0x28] sm:$0xff] }
   0xb   :  { %v102_v30 = vld [vmem:[%s329_s3 + $0xa8] sm:$0xff]  ;;  %v85_v31 = vld [vmem:[%s329_s3 + $0x20] sm:$0xff]  ;;  %v84_v33 = vld [vmem:[%s329_s3 + $0x18] sm:$0xff] }
   0xc   :  { %120 = vmatpush.msra.mxu2 %v93_v15  ;;  %140 = vmatpush.msra.mxu3 %v109_v16  ;;  %v101_v32 = vld [vmem:[%s329_s3 + $0xa0] sm:$0xff]  ;;  %v83_v34 = vld [vmem:[%s329_s3 + $0x10] sm:$0xff]  ;;  %v100_v35 = vld [vmem:[%s329_s3 + $0x98] sm:$0xff] }
   0xd   :  { %v82_v36 = vld [vmem:[%s329_s3 + $0x8] sm:$0xff]  ;;  %v99_v37 = vld [vmem:[%s329_s3 + $0x90] sm:$0xff]  ;;  %v81_v38 = vld [vmem:[%s329_s3] sm:$0xff] }
   0xe   :  { %121 = vmatpush.msra.mxu2 %v92_v17  ;;  %141 = vmatpush.msra.mxu3 %v108_v18  ;;  %v98_v39 = vld [vmem:[%s329_s3 + $0x88] sm:$0xff]  ;;  %v97_v40 = vld [vmem:[%s329_s3 + $0x80] sm:$0xff] }
   0xf   :  { %v29_v41 = vld [vmem:[%s332_s2] sm:$0x3] }
  0x10   :  { %122 = vmatpush.msra.mxu2 %v91_v19  ;;  %142 = vmatpush.msra.mxu3 %v107_v20  ;;  %v31_v42 = vperm.slane %v29_v41, 0  ;;  %v32_v43 = vperm.slane %v29_v41, 1  ;;  %v165_v50 = vld [vmem:[%s331_s4] ss:$0 sm:$0xff] }
  0x12   :  { %123 = vmatpush.msra.mxu2 %v90_v21  ;;  %143 = vmatpush.msra.mxu3 %v106_v22 }
  0x14   :  { %124 = vmatpush.msra.mxu2 %v89_v23  ;;  %144 = vmatpush.msra.mxu3 %v105_v24 }
  0x16   :  { %125 = vmatpush.msra.mxu2 %v88_v25  ;;  %145 = vmatpush.msra.mxu3 %v104_v26 }
  0x18   :  { %126 = vmatpush.msra.mxu2 %v87_v27  ;;  %146 = vmatpush.msra.mxu3 %v103_v28 }
  0x1a   :  { %127 = vmatpush.msra.mxu2 %v86_v29  ;;  %147 = vmatpush.msra.mxu3 %v102_v30 }
  0x1c   :  { %128 = vmatpush.msra.mxu2 %v85_v31  ;;  %148 = vmatpush.msra.mxu3 %v101_v32 }
  0x1e   :  { %129 = vmatpush.msra.mxu2 %v84_v33  ;;  %149 = vmatpush.msra.mxu3 %v100_v35 }
  0x20   :  { %130 = vmatpush.msra.mxu2 %v83_v34  ;;  %150 = vmatpush.msra.mxu3 %v99_v37 }
  0x22   :  { %131 = vmatpush.msra.mxu2 %v82_v36  ;;  %151 = vmatpush.msra.mxu3 %v98_v39 }
  0x24   :  { %132 = vmatpush.msra.mxu2 %v81_v38  ;;  %152 = vmatpush.msra.mxu3 %v97_v40 }
  0x86   :  { %v56_v44 = vpop.f32.mrf.mxu0  ;;  %v76_v45 = vpop.f32.mrf.mxu1 }
  0x87   :  { %v57_v46 = vadd.f32 %v56_v44, %v31_v42  ;;  %v77_v47 = vadd.f32 %v76_v45, %v32_v43 }
  0x89   :  { %v79_v48 = vmax.f32 %v57_v46, 0.0  ;;  %v80_v49 = vmax.f32 %v77_v47, 0.0 }
  0x8b   :  { %133 = vmatmul.f32.vlgmr.msra.gmra.mxu2 %v79_v48  ;;  %153 = vmatmul.f32.vlgmr.msra.gmra.mxu3 %v80_v49 }
 0x10e   :  { %v134_v51 = vpop.f32.mrf.mxu2  ;;  %v154_v52 = vpop.f32.mrf.mxu3 }
 0x10f   :  { %v135_v53 = vadd.f32 %v165_v50, %v134_v51 }
 0x111   :  { %v155_v54 = vadd.f32 %v154_v52, %v135_v53 }
 0x113   :  { %158 = vst.msk [vmem:[%s333_s5] sm:$0xff] %vm157_vm1, %v155_v54 }

</bundles_post_ra>
